<compile_context>
chip_gen: v7x
topology: tpu7x:2x2x1
jax: 0.10.0
libtpu: 0.0.40
codegen_flags: <defaults>
</compile_context>

<pallas_src>
import functools

import jax
import jax.numpy as jnp
from jax.experimental import pallas as pl
from jax.experimental.pallas import tpu as pltpu


# ---------------------------------------------------------------------------
# Tiling budgets
# ---------------------------------------------------------------------------
_VMEM_LIMIT_BYTES = 32 << 20   # explicit scoped-VMEM request; safe on v5e/v6e/v7x
_VMEM_WS_BUDGET = 16 << 20     # budget for the per-step VMEM working set
# Per grid step there are ~10 logical block-sized buffers (1 rate + 4 pop in,
# 4 pop + 1 a out), double-buffered by the pipeline, plus elementwise temps.
# 32 block-units is a conservative bound on total VMEM per block-element.
_BLOCK_UNITS = 32


def _round_down_128(x):
    return max(128, (x // 128) * 128)


def _pick_tiles_dense(B, C, N, itemsize):
    """Pick (bb, tn) for the (B, 4, C, N) layout.  tn is a multiple of 128
    (or N itself); bb grows the block across batch when per-batch N is small
    so per-step HBM traffic stays in the multi-MiB range."""
    max_elems = max(_VMEM_WS_BUDGET // (_BLOCK_UNITS * itemsize), 128)  # bb*C*tn
    tn = min(N, _round_down_128(max(max_elems // C, 128)))
    bb = max(1, min(B, max_elems // (C * tn)))
    # Keep >= 2 grid steps so both v7x TensorCores get work.
    if pl.cdiv(B, bb) * pl.cdiv(N, tn) < 2:
        if bb > 1:
            bb = (bb + 1) // 2
        elif tn >= 256:
            tn = _round_down_128((tn + 1) // 2)
    return bb, tn


def _pick_tiles_flat(B, CN, itemsize):
    """Pick (bb, tn) for the folded (B, 4, C*N) layout.  k is broadcast to
    (7, C*N), so its double-buffered cost (14 lane-units) is included."""
    budget_elems = _VMEM_WS_BUDGET // itemsize
    if (_BLOCK_UNITS + 14) * CN <= budget_elems:
        tn = CN                    # full lane extent: no 128-alignment required
        bb = max(1, min(B, (budget_elems - 14 * CN) // (_BLOCK_UNITS * CN)))
    else:
        tn = _round_down_128(budget_elems // (_BLOCK_UNITS + 14))
        bb = 1
    if pl.cdiv(CN, tn) * pl.cdiv(B, bb) < 2 and bb > 1:
        bb = (bb + 1) // 2
    return bb, tn


# ---------------------------------------------------------------------------
# Kernel bodies (pure VPU mul/add; dt*|k| pre-folded in the wrapper)
# ---------------------------------------------------------------------------
def _state_update(k, rate, R, A, I1, I2, ka_offset, ksr_gain):
    d_a = k(0) * rate * R                   # dt * ka
    if ka_offset:
        d_a = d_a + k(5) * R                # dt * ka_2 offset
    d_fi = k(1) * A                         # dt * kfi
    d_fr = k(2) * I1                        # dt * kfr
    d_si = k(3) * I1                        # dt * ksi
    d_sr = k(4) * I2                        # dt * ksr
    if ksr_gain:
        d_sr = d_sr + k(6) * rate * I2
    R_n = R + (d_fr - d_a)
    A_n = A + (d_a - d_fi)
    I1_n = I1 + ((d_fi + d_sr) - (d_fr + d_si))
    I2_n = I2 + (d_si - d_sr)
    return R_n, A_n, I1_n, I2_n


def _kinetics_kernel_bcn(k_ref, rate_ref, pop_ref, a_ref, out_ref, *,
                         ka_offset, ksr_gain):
    # k_ref: (7, C, 1), rate_ref: (bb, C, tn), pop_ref/out_ref: (bb, 4, C, tn),
    # a_ref: (bb, C, tn)
    rate = rate_ref[...]
    p = pop_ref[...]
    R, A, I1, I2 = p[:, 0], p[:, 1], p[:, 2], p[:, 3]
    k = lambda i: k_ref[i]                      # (C, 1) broadcasts vs (bb, C, tn)
    R_n, A_n, I1_n, I2_n = _state_update(k, rate, R, A, I1, I2,
                                         ka_offset, ksr_gain)
    out_ref[:, 0] = R_n
    out_ref[:, 1] = A_n
    out_ref[:, 2] = I1_n
    out_ref[:, 3] = I2_n
    a_ref[...] = A_n


def _kinetics_kernel_flat(k_ref, rate_ref, pop_ref, a_ref, out_ref, *,
                          ka_offset, ksr_gain):
    # k_ref: (7, tn), rate_ref/a_ref: (bb, 1, tn), pop_ref/out_ref: (bb, 4, tn)
    rate = rate_ref[:, 0]
    p = pop_ref[...]
    R, A, I1, I2 = p[:, 0], p[:, 1], p[:, 2], p[:, 3]
    k = lambda i: k_ref[i:i + 1, :]             # (1, tn) broadcasts vs (bb, tn)
    R_n, A_n, I1_n, I2_n = _state_update(k, rate, R, A, I1, I2,
                                         ka_offset, ksr_gain)
    out_ref[:, 0] = R_n
    out_ref[:, 1] = A_n
    out_ref[:, 2] = I1_n
    out_ref[:, 3] = I2_n
    a_ref[:, 0] = A_n


# ---------------------------------------------------------------------------
# Wrapper
# ---------------------------------------------------------------------------
def kinetics_forward(params, rate, pop, *, dt=0.01,
                     ka_offset=False, ksr_gain=False):
    """params: dict with 'ka','kfi','kfr','ksi','ksr' (plus 'ka_2' if
    ka_offset, 'ksr_2' if ksr_gain), each of shape (C, 1).
    rate: (B, C, N), pop: (B, 4, C, N).
    Returns (new_pop[:, 1], new_pop), matching the PyTorch module."""
    B, C, N = rate.shape
    assert pop.shape == (B, 4, C, N)
    dtype = rate.dtype
    itemsize = jnp.dtype(dtype).itemsize

    if ka_offset and "ka_2" not in params:
        raise ValueError("ka_offset=True requires params['ka_2']")
    if ksr_gain and "ksr_2" not in params:
        raise ValueError("ksr_gain=True requires params['ksr_2']")

    zeros = jnp.zeros((C, 1), dtype)
    k = jnp.stack([
        params["ka"], params["kfi"], params["kfr"],
        params["ksi"], params["ksr"],
        params["ka_2"] if ka_offset else zeros,
        params["ksr_2"] if ksr_gain else zeros,
    ], axis=0)
    # Fold |.| and dt into the constants so the kernel has no abs / dt* ops.
    k = (dt * jnp.abs(k)).astype(dtype)            # (7, C, 1)

    if N % 128 == 0:
        # ---- Lane-dense path: keep the (B, 4, C, N) layout, tiny (7,C,1) k.
        kernel = functools.partial(
            _kinetics_kernel_bcn, ka_offset=ka_offset, ksr_gain=ksr_gain)
        bb, tn = _pick_tiles_dense(B, C, N, itemsize)
        grid = (pl.cdiv(B, bb), pl.cdiv(N, tn))
        a_out, new_pop = pl.pallas_call(
            kernel,
            out_shape=(jax.ShapeDtypeStruct((B, C, N), dtype),
                       jax.ShapeDtypeStruct((B, 4, C, N), dtype)),
            grid_spec=pltpu.PrefetchScalarGridSpec(
                num_scalar_prefetch=0,
                grid=grid,
                in_specs=[
                    pl.BlockSpec((7, C, 1), lambda b, j: (0, 0, 0)),
                    pl.BlockSpec((bb, C, tn), lambda b, j: (b, 0, j)),
                    pl.BlockSpec((bb, 4, C, tn), lambda b, j: (b, 0, 0, j)),
                ],
                out_specs=[
                    pl.BlockSpec((bb, C, tn), lambda b, j: (b, 0, j)),
                    pl.BlockSpec((bb, 4, C, tn), lambda b, j: (b, 0, 0, j)),
                ],
            ),
            compiler_params=pltpu.CompilerParams(
                dimension_semantics=("parallel", "parallel"),
                vmem_limit_bytes=_VMEM_LIMIT_BYTES),
        )(k, rate, pop)
        return a_out, new_pop

    # ---- Lane-sparse path: contiguous fold of (C, N) -> C*N on the lane axis.
    # These reshapes are row-major contiguous => metadata-only (no HBM passes),
    # unlike the previous transpose+pad fold.
    CN = C * N
    rate_f = rate.reshape(B, 1, CN)
    pop_f = pop.reshape(B, 4, CN)
    k_flat = jnp.broadcast_to(k, (7, C, N)).reshape(7, CN)   # tiny vs. data

    kernel = functools.partial(
        _kinetics_kernel_flat, ka_offset=ka_offset, ksr_gain=ksr_gain)
    bb, tn = _pick_tiles_flat(B, CN, itemsize)
    # Lane-tile axis is the OUTER grid axis so the k block index is constant
    # across the inner batch loop (fetched ~once, not per step).
    grid = (pl.cdiv(CN, tn), pl.cdiv(B, bb))
    a_f, new_pop_f = pl.pallas_call(
        kernel,
        out_shape=(jax.ShapeDtypeStruct((B, 1, CN), dtype),
                   jax.ShapeDtypeStruct((B, 4, CN), dtype)),
        grid_spec=pltpu.PrefetchScalarGridSpec(
            num_scalar_prefetch=0,
            grid=grid,
            in_specs=[
                pl.BlockSpec((7, tn), lambda t, b: (0, t)),
                pl.BlockSpec((bb, 1, tn), lambda t, b: (b, 0, t)),
                pl.BlockSpec((bb, 4, tn), lambda t, b: (b, 0, t)),
            ],
            out_specs=[
                pl.BlockSpec((bb, 1, tn), lambda t, b: (b, 0, t)),
                pl.BlockSpec((bb, 4, tn), lambda t, b: (b, 0, t)),
            ],
        ),
        compiler_params=pltpu.CompilerParams(
            dimension_semantics=("parallel", "parallel"),
            vmem_limit_bytes=_VMEM_LIMIT_BYTES),
    )(k_flat, rate_f, pop_f)

    a_out = a_f.reshape(B, C, N)          # contiguous, metadata-only
    new_pop = new_pop_f.reshape(B, 4, C, N)
    return a_out, new_pop


# ---------------------------------------------------------------------------
# Pure-JAX reference (mirrors the PyTorch forward exactly)
# ---------------------------------------------------------------------------
def kinetics_ref(params, rate, pop, *, dt=0.01, ka_offset=False, ksr_gain=False):
    ka = jnp.abs(params["ka"]) * rate * pop[:, 0]
    if ka_offset:
        ka = ka + jnp.abs(params["ka_2"]) * pop[:, 0]
    kfi = jnp.abs(params["kfi"]) * pop[:, 1]
    kfr = jnp.abs(params["kfr"]) * pop[:, 2]
    ksi = jnp.abs(params["ksi"]) * pop[:, 2]
    ksr = jnp.abs(params["ksr"]) * pop[:, 3]
    if ksr_gain:
        ksr = ksr + jnp.abs(params["ksr_2"]) * rate * pop[:, 3]
    new_pop = jnp.stack([
        pop[:, 0] + dt * (-ka + kfr),
        pop[:, 1] + dt * (-kfi + ka),
        pop[:, 2] + dt * (-kfr - ksi + kfi + ksr),
        pop[:, 3] + dt * (-ksr + ksi),
    ], axis=1)
    return new_pop[:, 1], new_pop


def _make_inputs(key, B, C, N, *, ka_offset, ksr_gain):
    keys = jax.random.split(key, 9)
    params = {
        "ka":  jax.random.uniform(keys[0], (C, 1), jnp.float32) / 10,
        "kfi": jax.random.uniform(keys[1], (C, 1), jnp.float32) / 10,
        "kfr": jax.random.uniform(keys[2], (C, 1), jnp.float32) / 10,
        "ksi": jax.random.uniform(keys[3], (C, 1), jnp.float32) / 10,
        "ksr": jax.random.uniform(keys[4], (C, 1), jnp.float32) / 10,
    }
    if ka_offset:
        params["ka_2"] = jax.random.uniform(keys[5], (C, 1), jnp.float32) / 10
    if ksr_gain:
        params["ksr_2"] = jax.random.uniform(keys[6], (C, 1), jnp.float32) / 10
    rate = jax.random.uniform(keys[7], (B, C, N), jnp.float32)
    pop = jax.random.uniform(keys[8], (B, 4, C, N), jnp.float32)
    pop = pop / jnp.sum(pop, axis=1, keepdims=True)   # states sum to 1
    return params, rate, pop


def _check(case_key, B, C, N, *, ka_offset, ksr_gain, dt=0.01):
    params, rate, pop = _make_inputs(case_key, B, C, N,
                                     ka_offset=ka_offset, ksr_gain=ksr_gain)
    a_out, new_pop = kinetics_forward(params, rate, pop, dt=dt,
                                      ka_offset=ka_offset, ksr_gain=ksr_gain)
    jax.block_until_ready((a_out, new_pop))
    a_ref, np_ref = kinetics_ref(params, rate, pop, dt=dt,
                                 ka_offset=ka_offset, ksr_gain=ksr_gain)
    assert a_out.shape == a_ref.shape and new_pop.shape == np_ref.shape
    assert jnp.allclose(a_out, a_ref, atol=1e-6, rtol=1e-5)
    assert jnp.allclose(new_pop, np_ref, atol=1e-6, rtol=1e-5)


if __name__ == "__main__":
    key = jax.random.PRNGKey(0)
    k1, k2, k3, k4 = jax.random.split(key, 4)

    # Case 1: module default shape (chan=8), lane-sparse N -> folded-lane path.
    _check(k1, 2, 8, 16, ka_offset=False, ksr_gain=False)

    # Case 2: lane-dense N (multiple of 128) with ka_offset/ksr_gain enabled.
    _check(k2, 2, 8, 256, ka_offset=True, ksr_gain=True)

    # Case 3: lane-dense path with a partial (masked) batch block (B=3, bb=2).
    _check(k3, 3, 8, 384, ka_offset=False, ksr_gain=True)

    # Case 4: folded-lane path with a non-128 lane extent (C*N = 160).
    _check(k4, 2, 8, 20, ka_offset=True, ksr_gain=False)

    print("KERNEL_OK")
</pallas_src>

<mosaic_0001>
module attributes {stable_mosaic.version = 11 : i64} {
  func.func @_kinetics_kernel_flat(%arg0: i32, %arg1: i32, %arg2: memref<7x128xf32, #tpu.memory_space<vmem>>, %arg3: memref<1x1x128xf32, #tpu.memory_space<vmem>>, %arg4: memref<1x4x128xf32, #tpu.memory_space<vmem>>, %arg5: memref<1x1x128xf32, #tpu.memory_space<vmem>>, %arg6: memref<1x4x128xf32, #tpu.memory_space<vmem>>) attributes {dimension_semantics = [#tpu.dimension_semantics<parallel>, #tpu.dimension_semantics<parallel>], iteration_bounds = array<i64: 1, 2>, scalar_prefetch = 0 : i64, scratch_operands = 0 : i64, tpu.core_type = #tpu.core_type<tc>, window_params = [{transform_indices = @transform_0, window_bounds = array<i64: 7, 128>}, {transform_indices = @transform_1, window_bounds = array<i64: 1, 1, 128>}, {transform_indices = @transform_2, window_bounds = array<i64: 1, 4, 128>}, {transform_indices = @transform_3, window_bounds = array<i64: 1, 1, 128>}, {transform_indices = @transform_4, window_bounds = array<i64: 1, 4, 128>}]} {
    %c0 = arith.constant 0 : index
    %c0_0 = arith.constant 0 : index
    %c0_1 = arith.constant 0 : index
    %0 = vector.load %arg3[%c0, %c0_0, %c0_1] : memref<1x1x128xf32, #tpu.memory_space<vmem>>, vector<1x1x128xf32>
    %1 = vector.shape_cast %0 : vector<1x1x128xf32> to vector<1x128xf32>
    %c0_2 = arith.constant 0 : index
    %c0_3 = arith.constant 0 : index
    %c0_4 = arith.constant 0 : index
    %2 = vector.load %arg4[%c0_2, %c0_3, %c0_4] : memref<1x4x128xf32, #tpu.memory_space<vmem>>, vector<1x4x128xf32>
    %3 = vector.extract_strided_slice %2 {offsets = [0, 0, 0], sizes = [1, 1, 128], strides = [1, 1, 1]} : vector<1x4x128xf32> to vector<1x1x128xf32>
    %4 = vector.shape_cast %3 : vector<1x1x128xf32> to vector<1x128xf32>
    %5 = vector.extract_strided_slice %2 {offsets = [0, 1, 0], sizes = [1, 1, 128], strides = [1, 1, 1]} : vector<1x4x128xf32> to vector<1x1x128xf32>
    %6 = vector.shape_cast %5 : vector<1x1x128xf32> to vector<1x128xf32>
    %7 = vector.extract_strided_slice %2 {offsets = [0, 2, 0], sizes = [1, 1, 128], strides = [1, 1, 1]} : vector<1x4x128xf32> to vector<1x1x128xf32>
    %8 = vector.shape_cast %7 : vector<1x1x128xf32> to vector<1x128xf32>
    %9 = vector.extract_strided_slice %2 {offsets = [0, 3, 0], sizes = [1, 1, 128], strides = [1, 1, 1]} : vector<1x4x128xf32> to vector<1x1x128xf32>
    %10 = vector.shape_cast %9 : vector<1x1x128xf32> to vector<1x128xf32>
    %c0_5 = arith.constant 0 : index
    %c0_6 = arith.constant 0 : index
    %11 = vector.load %arg2[%c0_5, %c0_6] : memref<7x128xf32, #tpu.memory_space<vmem>>, vector<1x128xf32>
    %12 = arith.mulf %11, %1 : vector<1x128xf32>
    %13 = arith.mulf %12, %4 : vector<1x128xf32>
    %c1 = arith.constant 1 : index
    %c0_7 = arith.constant 0 : index
    %14 = vector.load %arg2[%c1, %c0_7] : memref<7x128xf32, #tpu.memory_space<vmem>>, vector<1x128xf32>
    %15 = arith.mulf %14, %6 : vector<1x128xf32>
    %c2 = arith.constant 2 : index
    %c0_8 = arith.constant 0 : index
    %16 = vector.load %arg2[%c2, %c0_8] : memref<7x128xf32, #tpu.memory_space<vmem>>, vector<1x128xf32>
    %17 = arith.mulf %16, %8 : vector<1x128xf32>
    %c3 = arith.constant 3 : index
    %c0_9 = arith.constant 0 : index
    %18 = vector.load %arg2[%c3, %c0_9] : memref<7x128xf32, #tpu.memory_space<vmem>>, vector<1x128xf32>
    %19 = arith.mulf %18, %8 : vector<1x128xf32>
    %c4 = arith.constant 4 : index
    %c0_10 = arith.constant 0 : index
    %20 = vector.load %arg2[%c4, %c0_10] : memref<7x128xf32, #tpu.memory_space<vmem>>, vector<1x128xf32>
    %21 = arith.mulf %20, %10 : vector<1x128xf32>
    %22 = arith.subf %17, %13 : vector<1x128xf32>
    %23 = arith.addf %4, %22 : vector<1x128xf32>
    %24 = arith.subf %13, %15 : vector<1x128xf32>
    %25 = arith.addf %6, %24 : vector<1x128xf32>
    %26 = arith.addf %15, %21 : vector<1x128xf32>
    %27 = arith.addf %17, %19 : vector<1x128xf32>
    %28 = arith.subf %26, %27 : vector<1x128xf32>
    %29 = arith.addf %8, %28 : vector<1x128xf32>
    %30 = arith.subf %19, %21 : vector<1x128xf32>
    %31 = arith.addf %10, %30 : vector<1x128xf32>
    %c0_11 = arith.constant 0 : index
    %c0_12 = arith.constant 0 : index
    %c0_13 = arith.constant 0 : index
    %32 = vector.load %arg6[%c0_11, %c0_12, %c0_13] : memref<1x4x128xf32, #tpu.memory_space<vmem>>, vector<1x1x128xf32>
    %33 = vector.shape_cast %32 : vector<1x1x128xf32> to vector<1x128xf32>
    %34 = vector.shape_cast %23 : vector<1x128xf32> to vector<1x1x128xf32>
    tpu.vector_store %arg6[%c0_11, %c0_12, %c0_13], %34 {strides = array<i32>} : memref<1x4x128xf32, #tpu.memory_space<vmem>>, vector<1x1x128xf32>,
    %c0_14 = arith.constant 0 : index
    %c1_15 = arith.constant 1 : index
    %c0_16 = arith.constant 0 : index
    %35 = vector.load %arg6[%c0_14, %c1_15, %c0_16] : memref<1x4x128xf32, #tpu.memory_space<vmem>>, vector<1x1x128xf32>
    %36 = vector.shape_cast %35 : vector<1x1x128xf32> to vector<1x128xf32>
    %37 = vector.shape_cast %25 : vector<1x128xf32> to vector<1x1x128xf32>
    tpu.vector_store %arg6[%c0_14, %c1_15, %c0_16], %37 {strides = array<i32>} : memref<1x4x128xf32, #tpu.memory_space<vmem>>, vector<1x1x128xf32>,
    %c0_17 = arith.constant 0 : index
    %c2_18 = arith.constant 2 : index
    %c0_19 = arith.constant 0 : index
    %38 = vector.load %arg6[%c0_17, %c2_18, %c0_19] : memref<1x4x128xf32, #tpu.memory_space<vmem>>, vector<1x1x128xf32>
    %39 = vector.shape_cast %38 : vector<1x1x128xf32> to vector<1x128xf32>
    %40 = vector.shape_cast %29 : vector<1x128xf32> to vector<1x1x128xf32>
    tpu.vector_store %arg6[%c0_17, %c2_18, %c0_19], %40 {strides = array<i32>} : memref<1x4x128xf32, #tpu.memory_space<vmem>>, vector<1x1x128xf32>,
    %c0_20 = arith.constant 0 : index
    %c3_21 = arith.constant 3 : index
    %c0_22 = arith.constant 0 : index
    %41 = vector.load %arg6[%c0_20, %c3_21, %c0_22] : memref<1x4x128xf32, #tpu.memory_space<vmem>>, vector<1x1x128xf32>
    %42 = vector.shape_cast %41 : vector<1x1x128xf32> to vector<1x128xf32>
    %43 = vector.shape_cast %31 : vector<1x128xf32> to vector<1x1x128xf32>
    tpu.vector_store %arg6[%c0_20, %c3_21, %c0_22], %43 {strides = array<i32>} : memref<1x4x128xf32, #tpu.memory_space<vmem>>, vector<1x1x128xf32>,
    %c0_23 = arith.constant 0 : index
    %c0_24 = arith.constant 0 : index
    %c0_25 = arith.constant 0 : index
    %44 = vector.load %arg5[%c0_23, %c0_24, %c0_25] : memref<1x1x128xf32, #tpu.memory_space<vmem>>, vector<1x1x128xf32>
    %45 = vector.shape_cast %44 : vector<1x1x128xf32> to vector<1x128xf32>
    %46 = vector.shape_cast %25 : vector<1x128xf32> to vector<1x1x128xf32>
    tpu.vector_store %arg5[%c0_23, %c0_24, %c0_25], %46 {strides = array<i32>} : memref<1x1x128xf32, #tpu.memory_space<vmem>>, vector<1x1x128xf32>,
    return
  }
  func.func @transform_0(%arg0: i32, %arg1: i32) -> (i32, i32) {
    %c0_i32 = arith.constant 0 : i32
    %c0_i32_0 = arith.constant 0 : i32
    return %c0_i32, %arg0 : i32, i32
  }
  func.func @transform_1(%arg0: i32, %arg1: i32) -> (i32, i32, i32) {
    %c0_i32 = arith.constant 0 : i32
    %c0_i32_0 = arith.constant 0 : i32
    return %arg1, %c0_i32, %arg0 : i32, i32, i32
  }
  func.func @transform_2(%arg0: i32, %arg1: i32) -> (i32, i32, i32) {
    %c0_i32 = arith.constant 0 : i32
    %c0_i32_0 = arith.constant 0 : i32
    return %arg1, %c0_i32, %arg0 : i32, i32, i32
  }
  func.func @transform_3(%arg0: i32, %arg1: i32) -> (i32, i32, i32) {
    %c0_i32 = arith.constant 0 : i32
    %c0_i32_0 = arith.constant 0 : i32
    return %arg1, %c0_i32, %arg0 : i32, i32, i32
  }
  func.func @transform_4(%arg0: i32, %arg1: i32) -> (i32, i32, i32) {
    %c0_i32 = arith.constant 0 : i32
    %c0_i32_0 = arith.constant 0 : i32
    return %arg1, %c0_i32, %arg0 : i32, i32, i32
  }
}

</mosaic_0001>

<bundles_post_ra>
// kernel: tpu_custom_call.1
= control target key start
LH: loop header
LB: loop body
LE: loop exit
PB: predicated region body
PF: predicated region fallthrough
CT: control target
= control target key end

     0   :  { %10 = vsyncpa [#allocation3], 0  ;;  %s1063_s0 = inlined_call_operand.hbm [shape: f32[7,128], index: 0, kind: input, shape index: {}]   ;;  %s1064_s1 = inlined_call_operand.vmem [shape: f32[2,1,128], index: 1, kind: input, shape index: {}]   ;;  %s1065_s2 = inlined_call_operand.hbm [shape: f32[2,4,128], index: 2, kind: input, shape index: {}]   ;;  %s1066_s3 = inlined_call_operand.hbm [shape: f32[2,1,128], index: 3, kind: output, shape index: {0}]   ;;  %s1067_s4 = inlined_call_operand.hbm [shape: f32[2,4,128], index: 4, kind: output, shape index: {1}]  }
   0x1   :  { %11 = vsyncpa [#allocation6], 0 }
   0x2   :  { %13 = vsyncpa [#allocation6 + $0x1], 0 }
   0x3   :  { %14 = vsyncpa [#allocation4], 0 }
   0x4   :  { %16 = vsyncpa [#allocation4 + $0x1], 0 }
   0x5   :  { %17 = vsyncpa [#allocation9], 0 }
   0x6   :  { %19 = vsyncpa [#allocation9 + $0x1], 0  ;;  %s800_s15 = smov 0   ;;  %s802_s16 = smov 0  }
   0x7   :  { %s804_s17 = smov 0   ;;  %s806_s18 = smov 0  }
   0x8   :  { %s808_s19 = smov 0   ;;  %s810_s20 = smov 0  }
   0x9 LB: > { %s499_s21 = sadd.s32 4294967295, %s769_s20   ;;  %s500_s22 = sadd.s32 4294967294, %s769_s20   ;;  %s769_s20 = sphi %s810_s20, %s25_s20   ;;  %s765_s19 = sphi %s808_s19, %s1092_s19   ;;  %s761_s18 = sphi %s806_s18, %s1091_s18   ;;  %s757_s17 = sphi %s804_s17, %s1090_s17   ;;  %s753_s16 = sphi %s802_s16, %s1089_s16   ;;  %s749_s15 = sphi %s800_s15, %s1088_s15  }
   0xa   : > { %p113_p0 = scmp.ne.s32.totalorder %s753_s16, %s749_s15  ;;  %p834_p1 = scmp.eq.s32.totalorder %s499_s21, 0 }
   0xb   : > { %p838_p2 = scmp.eq.s32.totalorder %s499_s21, 1  ;;  %p145_p3 = scmp.eq.s32.totalorder %s500_s22, 1 }
   0xc   : > { %s1072_s23 = scalar_select %p834_p1, 1, 0 }
   0xd   : > { %s1073_s24 = scalar_select %p838_p2, 1, 0 }
   0xe   : > { %p844_p4 = por %p834_p1, %p113_p0  ;;  %p501_p5 = scmp.ge.s32.totalorder %s769_s20, 1 }
   0xf   : > { %p849_p6 = por %p145_p3, %p113_p0  ;;  %p180_p7 = scmp.lt.s32.totalorder %s769_s20, 3 }
  0x10   : > { %s1074_s25 = scalar_select %p844_p4, 1, 0 }
  0x11   : > { %s1075_s26 = scalar_select %p849_p6, 1, 0 }
  0x12   : > { %p854_p8 = pnand %p501_p5, %p180_p7  ;;  %s771_s28 = smov [#allocation2]  }
  0x13   : > { %s195_s29 = sshll.u32 %s771_s28, 4  ;;  %s34_s5 = sadd.s32 1, %s765_s19  ;;  %s196_s29 = int_to_ptr.vmem [resolvable:$true] %s195_s29 }
  0x14   : > { %s1076_s27 = scalar_select %p854_p8, 1, 0 }
  0x15   : > { %p525_p10 = pneg %p854_p8  ;;  %s100_s6 = sadd.s32 1, %s757_s17 }
  0x16   : > { %p869_p12 = scmp.ge.s32.totalorder %s34_s5, 2  ;;  %s593_s10 = scalar_lea.hbm %s1063_s0, 128 }
  0x17   : > { %p863_p11 = pnand %p525_p10, %p834_p1  ;;  %p594_p13 = scmp.ne.s32.totalorder %s1063_s0, %s593_s10 }
  0x18   : > { %s1078_s7 = scalar_select %p869_p12, 1, 0 }
  0x19   : > { %p595_p0 = pneg %p863_p11  ;;  %p600_p7 = scmp.lt.u32.totalorder %s593_s10, %s1063_s0 }
  0x1b   : > { %p596_p3 = pnand %p595_p0, %p594_p13 }
  0x1d   : > { %p597_p5 = pneg %p596_p3 }
  0x1f   : > { %p602_p10 = pnand %p600_p7, %p597_p5 }
  0x21   : > { %605 = shalt.err (!%p602_p10)
}
  0x22   : > { %s606_s21 = scalar_lea.vmem %s196_s29, 128  ;;  %p614_p1 = scmp.lt.s32.totalorder %s196_s29, %s196_s29 }
  0x23   : > { %p607_p9 = scmp.ne.s32.totalorder %s196_s29, %s606_s21  ;;  %p615_p8 = scmp.lt.s32.totalorder %s606_s21, %s606_s21 }
  0x25   : > { %p609_p6 = pnand %p607_p9, %p595_p0  ;;  %p616_p2 = por %p615_p8, %p614_p1 }
  0x27   : > { %p610_p4 = pneg %p609_p6 }
  0x29   : > { %p617_p12 = pnand %p616_p2, %p610_p4 }
  0x2b   : > { %620 = shalt.err (!%p617_p12)
}
  0x2c   : > { %528 = dma.hbm_to_vmem [thread:$0]  (!%p863_p11), %s1063_s0, 128, %s196_s29, [#allocation3]  }
  0x2d   : > { %p1079_p1 = scmp.ne.s32.totalorder %s1078_s7, 0  ;;  %p107_p2 = scmp.ne.s32.totalorder %s757_s17, %s753_s16 }
  0x2e   : > { %p108_p4 = scmp.eq.s32.totalorder %s769_s20, 0  ;;  %p541_p6 = scmp.lt.s32.totalorder %s769_s20, 2 }
  0x2f   : > { %s1094_s5 = smov (%p1079_p1, %s34_s5), 0  ;;  %p1080_p12 = scmp.ne.s32.totalorder %s1073_s24, 0 }
  0x30   : > { %s95_s30 = ssub.s32 %s765_s19, %s1094_s5  ;;  %p109_p9 = por %p108_p4, %p107_p2 }
  0x31   : > { %p98_p8 = scmp.eq.s32.totalorder %s95_s30, 0  ;;  %p901_p13 = por %p1080_p12, %p107_p2 }
  0x32   : > { %s215_s9 = sand.u32 1, %s757_s17   ;;  %s505_s7 = sshll.u32 %s765_s19, 6 }
  0x33   : > { %s909_s10 = scalar_select %p98_p8, %s757_s17, %s100_s6  }
  0x34   : > { %s504_s29 = sshll.u32 %s215_s9, 2  ;;  %s915_s13 = scalar_lea.hbm %s1065_s2, %s505_s7 }
  0x35   : > { %s219_s24 = scalar_lea.vmem [#allocation5], %s504_s29  ;;  %p919_p11 = pnand %p541_p6, %p109_p9 }
  0x36   : > { %s227_s14 = sshll.u32 %s219_s24, 4  ;;  %s216_s6 = scalar_lea.sflag [#allocation6], %s215_s9  ;;  %s917_s14 = int_to_ptr.vmem [resolvable:$true] %s227_s14 }
  0x37   : > { %s621_s22 = scalar_lea.hbm %s915_s13, 64  ;;  %p623_p3 = pneg %p919_p11 }
  0x38   : > { %p622_p0 = scmp.ne.s32.totalorder %s915_s13, %s621_s22  ;;  %s626_s29 = scalar_lea.hbm %s1065_s2, 128 }
  0x39   : > { %p627_p10 = scmp.lt.u32.totalorder %s915_s13, %s1065_s2  ;;  %p628_p1 = scmp.lt.u32.totalorder %s626_s29, %s621_s22 }
  0x3a   : > { %p624_p5 = pnand %p623_p3, %p622_p0  ;;  %p630_p4 = scmp.lt.u32.totalorder %s621_s22, %s915_s13 }
  0x3b   : > { %p629_p2 = por %p628_p1, %p627_p10 }
  0x3c   : > { %p625_p7 = pneg %p624_p5 }
  0x3d   : > { %p631_p6 = por %p630_p4, %p629_p2 }
  0x3f   : > { %p632_p8 = pnand %p631_p6, %p625_p7 }
  0x41   : > { %635 = shalt.err (!%p632_p8)
}
  0x42   : > { %s636_s9 = scalar_lea.vmem %s917_s14, 64  ;;  %s772_s12 = smov [#allocation5]  }
  0x43   : > { %p637_p9 = scmp.ne.s32.totalorder %s917_s14, %s636_s9  ;;  %s641_s24 = sshll.u32 %s772_s12, 4  ;;  %s642_s24 = int_to_ptr.vmem [resolvable:$false] %s641_s24 }
  0x44   : > { %s643_s28 = scalar_lea.vmem %s642_s24, 128  ;;  %p644_p5 = scmp.lt.s32.totalorder %s917_s14, %s642_s24 }
  0x45   : > { %p639_p12 = pnand %p637_p9, %p623_p3  ;;  %p645_p10 = scmp.lt.s32.totalorder %s643_s28, %s636_s9 }
  0x47   : > { %p640_p0 = pneg %p639_p12  ;;  %p646_p1 = por %p645_p10, %p644_p5 }
  0x49   : > { %p647_p2 = pnand %p646_p1, %p640_p0 }
  0x4b   : > { %650 = shalt.err (!%p647_p2)
}
  0x4c   : > { %532 = dma.hbm_to_vmem [thread:$0]  (!%p919_p11), %s915_s13, 64, %s917_s14, %s216_s6  }
  0x4d   : > { %p1083_p7 = scmp.ne.s32.totalorder %s1076_s27, 0 }
  0x4e   : > { %p1084_p3 = scmp.ne.s32.totalorder (!%p1083_p7), %s1072_s23, 0 }
  0x4f   : > { %236 = sbr.rel (%p1083_p7) target bundleno = 144 (0x90), region = 32 }
  0x56   : > { %732 = dma.done.wait (%p1084_p3), [#allocation3], 128  }
  0x57   : > { %734 = vsyncadd (%p1084_p3), [#allocation3], 4294967168  ;;  %s955_s22 = sand.u32 1, %s753_s16   ;;  %p1085_p11 = scmp.ne.s32.totalorder %s1074_s25, 0 }
  0x58   : > { %s508_s21 = sshll.u32 %s955_s22, 2  ;;  %s243_s30 = scalar_lea.sflag [#allocation6], %s955_s22 }
  0x59   : > { %s246_s13 = scalar_lea.vmem [#allocation5], %s508_s21 }
  0x5a   : > { %736 = dma.done.wait (%p1085_p11), %s243_s30, 64  }
  0x5b   : > { %738 = vsyncadd (%p1085_p11), %s243_s30, 4294967232  ;;  %p281_p4 = scmp.lt.s32.totalorder %s761_s18, 1  ;;  %v288_v1 = vld [vmem:[%s246_s13] sm:$0xf]  ;;  %v289_v2 = vld [vmem:[#allocation2] sm:$0x1] }
  0x5c   : > { %v297_v4 = vld [vmem:[#allocation2 + $0x2] sm:$0x1]  ;;  %v298_v5 = vrot.slane %v288_v1, 2  ;;  %v292_v6 = vld [vmem:[#allocation2 + $0x1] sm:$0x1]  ;;  %v294_v7 = vrot.slane %v288_v1, 1 }
  0x5d   : > { %s282_s23 = scalar_select %p281_p4, %s761_s18, 1  ;;  %v301_v8 = vld [vmem:[#allocation2 + $0x3] sm:$0x1]  ;;  %v303_v9 = vld [vmem:[#allocation2 + $0x4] sm:$0x1]  ;;  %v304_v10 = vrot.slane %v288_v1, 3 }
  0x5e   : > { %v300_v12 = vmul.f32 %v298_v5, %v297_v4  ;;  %v296_v13 = vmul.f32 %v294_v7, %v292_v6  ;;  %v302_v14 = vmul.f32 %v301_v8, %v298_v5  ;;  %s273_s25 = scalar_lea.vmem [#allocation7], %s955_s22  ;;  %s511_s7 = sshll.u32 %s761_s18, 4 }
  0x5f   : > { %s286_s6 = scalar_lea.vmem %s1064_s1, %s282_s23  ;;  %v306_v15 = vmul.f32 %v304_v10, %v303_v9  ;;  %s350_s29 = sshll.u32 %s273_s25, 4  ;;  %s977_s29 = int_to_ptr.vmem [resolvable:$true] %s350_s29 }
  0x60   : > { %v287_v0 = vld [vmem:[%s286_s6] sm:$0x1]  ;;  %v315_v18 = vadd.f32 %v302_v14, %v300_v12  ;;  %s974_s11 = scalar_lea.vmem [#allocation8], %s508_s21  ;;  %s512_s12 = sshll.u32 %s761_s18, 6 }
  0x61   : > { %v290_v3 = vmul.f32 %v289_v2, %v287_v0  ;;  %v314_v19 = vadd.f32 %v306_v15, %v296_v13  ;;  %v321_v20 = vsub.f32 %v302_v14, %v306_v15  ;;  %s364_s9 = sshll.u32 %s974_s11, 4  ;;  %s984_s21 = scalar_lea.hbm %s1066_s3, %s511_s7  ;;  %s986_s9 = int_to_ptr.vmem [resolvable:$true] %s364_s9 }
  0x62   : > { %s992_s23 = scalar_lea.hbm %s1067_s4, %s512_s12  ;;  %s332_s18 = scalar_lea.sflag [#allocation4], %s955_s22 }
  0x63   : > { %v291_v11 = vmul.f32 %v290_v3, %v288_v1  ;;  %v316_v23 = vsub.f32 %v314_v19, %v315_v18  ;;  %v323_v24 = vrot.slane %v321_v20, 5  ;;  %s651_s27 = scalar_lea.vmem %s977_s29, 16  ;;  %s773_s14 = smov [#allocation7]  }
  0x64   : > { %p652_p6 = scmp.ne.s32.totalorder %s977_s29, %s651_s27  ;;  %s655_s6 = sshll.u32 %s773_s14, 4  ;;  %s656_s6 = int_to_ptr.vmem [resolvable:$false] %s655_s6 }
  0x65   : > { %v307_v16 = vsub.f32 %v300_v12, %v291_v11  ;;  %v309_v17 = vsub.f32 %v291_v11, %v296_v13  ;;  %v318_v26 = vrot.slane %v316_v23, 6  ;;  %v325_v27 = vadd.f32 %v323_v24, %v288_v1  ;;  %s657_s7 = scalar_lea.vmem %s656_s6, 32  ;;  %p658_p12 = scmp.lt.s32.totalorder %s977_s29, %s656_s6 }
  0x66   : > { %p653_p8 = pnand %p652_p6, %p901_p13  ;;  %p659_p0 = scmp.lt.s32.totalorder %s657_s7, %s651_s27 }
  0x67   : > { %v308_v21 = vadd.f32 %v307_v16, %v288_v1  ;;  %v311_v22 = vrot.slane %v309_v17, 7  ;;  %v320_v28 = vadd.f32 %v318_v26, %v288_v1  ;;  %329 = vst [vmem:[%s974_s11] sm:$0x8] %v325_v27 }
  0x68   : > { %p654_p9 = pneg %p653_p8  ;;  %p660_p5 = por %p659_p0, %p658_p12 }
  0x69   : > { %326 = vst [vmem:[%s974_s11] sm:$0x1] %v308_v21  ;;  %v313_v25 = vadd.f32 %v311_v22, %v288_v1 }
  0x6a   : > { %p661_p10 = pnand %p660_p5, %p654_p9 }
  0x6b   : > { %327 = vst [vmem:[%s974_s11] sm:$0x2] %v313_v25  ;;  %330 = vst [vmem:[%s273_s25 - $0x1] sm:$0x2] %v313_v25 }
  0x6c   : > { %664 = shalt.err (!%p661_p10)
}
  0x6d   : > { %s665_s25 = scalar_lea.hbm %s984_s21, 16  ;;  %s669_s28 = scalar_lea.hbm %s1066_s3, 32 }
  0x6e   : > { %p666_p1 = scmp.ne.s32.totalorder %s984_s21, %s665_s25  ;;  %p670_p3 = scmp.lt.u32.totalorder %s984_s21, %s1066_s3 }
  0x6f   : > { %p671_p11 = scmp.lt.u32.totalorder %s669_s28, %s665_s25  ;;  %p673_p6 = scmp.lt.u32.totalorder %s665_s25, %s984_s21 }
  0x70   : > { %p667_p2 = pnand %p666_p1, %p901_p13 }
  0x71   : > { %p672_p4 = por %p671_p11, %p670_p3 }
  0x72   : > { %p668_p7 = pneg %p667_p2 }
  0x73   : > { %p674_p8 = por %p673_p6, %p672_p4 }
  0x75   : > { %p675_p9 = pnand %p674_p8, %p668_p7 }
  0x77   : > { %678 = shalt.err (!%p675_p9)
}
  0x78   : > { %521 = dma.vmem_to_hbm [thread:$0]  (%p901_p13), %s977_s29, 16, %s984_s21, %s332_s18   ;;  %328 = vst [vmem:[%s974_s11] sm:$0x4] %v320_v28 }
  0x79   : > { %s336_s27 = scalar_lea.sflag [#allocation9], %s955_s22  ;;  %s679_s14 = scalar_lea.vmem %s986_s9, 64 }
  0x7a   : > { %p680_p12 = scmp.ne.s32.totalorder %s986_s9, %s679_s14  ;;  %s774_s6 = smov [#allocation8]  }
  0x7b   : > { %s683_s7 = sshll.u32 %s774_s6, 4  ;;  %s684_s7 = int_to_ptr.vmem [resolvable:$false] %s683_s7 }
  0x7c   : > { %p681_p0 = pnand %p680_p12, %p901_p13  ;;  %s685_s25 = scalar_lea.vmem %s684_s7, 128 }
  0x7d   : > { %p686_p10 = scmp.lt.s32.totalorder %s986_s9, %s684_s7  ;;  %p687_p1 = scmp.lt.s32.totalorder %s685_s25, %s679_s14 }
  0x7e   : > { %p682_p5 = pneg %p681_p0 }
  0x7f   : > { %p688_p2 = por %p687_p1, %p686_p10 }
  0x81   : > { %p689_p7 = pnand %p688_p2, %p682_p5 }
  0x83   : > { %692 = shalt.err (!%p689_p7)
}
  0x84   : > { %s693_s22 = scalar_lea.hbm %s992_s23, 64  ;;  %s697_s21 = scalar_lea.hbm %s1067_s4, 128 }
  0x85   : > { %p694_p3 = scmp.ne.s32.totalorder %s992_s23, %s693_s22  ;;  %p698_p6 = scmp.lt.u32.totalorder %s992_s23, %s1067_s4 }
  0x86   : > { %p699_p8 = scmp.lt.u32.totalorder %s697_s21, %s693_s22  ;;  %p701_p12 = scmp.lt.u32.totalorder %s693_s22, %s992_s23 }
  0x87   : > { %p695_p11 = pnand %p694_p3, %p901_p13 }
  0x88   : > { %p700_p9 = por %p699_p8, %p698_p6 }
  0x89   : > { %p696_p4 = pneg %p695_p11 }
  0x8a   : > { %p702_p0 = por %p701_p12, %p700_p9 }
  0x8c   : > { %p703_p5 = pnand %p702_p0, %p696_p4 }
  0x8e   : > { %706 = shalt.err (!%p703_p5)
}
  0x8f   : > { %522 = dma.vmem_to_hbm [thread:$0]  (%p901_p13), %s986_s9, 64, %s992_s23, %s336_s27  }
  0x90 PF: > { %s376_s24 = sand.u32 1, %s749_s15   ;;  %p1086_p10 = scmp.ne.s32.totalorder %s1075_s26, 0 }
  0x91   : > { %p1087_p1 = scmp.ge.s32.totalorder %s769_s20, 2  ;;  %s377_s28 = scalar_lea.sflag [#allocation4], %s376_s24 }
  0x93   : > { %p534_p2 = pnand %p1087_p1, %p1086_p10 }
  0x95   : > { %740 = dma.done.wait (!%p534_p2), %s377_s28, 16  }
  0x96   : > { %742 = vsyncadd (!%p534_p2), %s377_s28, 4294967280  ;;  %s385_s30 = scalar_lea.sflag [#allocation9], %s376_s24 }
  0x97   : > { %744 = dma.done.wait (!%p534_p2), %s385_s30, 64  }
  0x98   : > { %746 = vsyncadd (!%p534_p2), %s385_s30, 4294967232  ;;  %s25_s20 = sadd.s32 1, %s769_s20   ;;  %s1088_s15 = smov %s753_s16 }
  0x99   : > { %p22_p7 = scmp.ge.s32.totalorder %s25_s20, 4   ;;  %s1089_s16 = smov %s757_s17 }
  0x9a   : > { %s1090_s17 = smov %s909_s10  ;;  %s1091_s18 = smov %s765_s19 }
  0x9b   : > { %s1092_s19 = smov %s1094_s5  ;;  %24 = sbr.rel (!%p22_p7) target bundleno = 9 (0x9), region = 103 }
  0xa2   :  { %390 = vsyncpa [#allocation3], 1 }
  0xa3   :  { %392 = vsyncpa [#allocation3 + $0x1], 1 }
  0xa4   :  { %393 = vsyncpa [#allocation6], 1 }
  0xa5   :  { %395 = vsyncpa [#allocation6 + $0x1], 1 }
  0xa6   :  { %396 = vsyncpa [#allocation4], 1 }
  0xa7   :  { %398 = vsyncpa [#allocation4 + $0x1], 1 }
  0xa8   :  { %399 = vsyncpa [#allocation9], 1 }
  0xa9   :  { %401 = vsyncpa [#allocation9 + $0x1], 1 }

</bundles_post_ra>
